<compile_context>
chip_gen: v5e
topology: v5e:2x2
jax: 0.10.0
libtpu: 0.0.40
codegen_flags: <defaults>
</compile_context>

<pallas_src>
import functools

import jax
import jax.numpy as jnp
from jax.experimental import pallas as pl
from jax.experimental.pallas import tpu as pltpu

_LANES = 128


def _rotate_lanes(x, shift):
    """result[..., i] = x[..., (i + shift) % n]; static lane rotation."""
    n = x.shape[-1]
    shift = shift % n
    if shift == 0:
        return x
    # Lowers to lane slice + concatenate (supported by Mosaic; same pattern as
    # rotary-embedding kernels). TODO(synk): on real HW pltpu.roll with a
    # non-negative axis would use the XLU rotate directly.
    return jnp.concatenate([x[..., shift:], x[..., :shift]], axis=-1)


def _segment_sum_lanes(x, group):
    """Sum within aligned groups of `group` consecutive lanes.

    `group` must be a power of two dividing the lane extent. After the
    butterfly every lane holds its aligned group's sum (already broadcast
    back). Exact f32 arithmetic (no MXU passes).
    """
    if group <= 1:
        return x
    n = x.shape[-1]
    # (1, n) lane index broadcasts over sublanes in the selects below.
    lane = jax.lax.broadcasted_iota(jnp.int32, (1, n), 1)
    s = x
    k = 1
    while k < group:
        plus_k = _rotate_lanes(s, k)        # lane i <- lane i + k
        minus_k = _rotate_lanes(s, n - k)   # lane i <- lane i - k
        take_plus = (lane & k) == 0         # partner is i + k
        s = s + jnp.where(take_plus, plus_k, minus_k)
        k *= 2
    return s


def _lane_dense_kernel(x_ref, o_ref, *, group):
    # x_ref/o_ref: (TB, 128) tile; each 128-lane row packs 128 // group
    # complete groups of `group` consecutive latent parameters.
    x = x_ref[...].astype(jnp.float32)
    s = _segment_sum_lanes(x, group)
    o_ref[...] = (x / s).astype(o_ref.dtype)


def _rowwise_kernel(x_ref, o_ref):
    # Only used for D > 128 (lanes already full): reduce over the lane axis.
    x = x_ref[...].astype(jnp.float32)
    s = jnp.sum(x, axis=-1, keepdims=True)
    o_ref[...] = (x / s).astype(o_ref.dtype)


class ScalarizationParameterTransformPallas:
    """Concrete simplex-weight scalarization parameter transform (Pallas).

    TODO(synk): the PyTorch base class leaves forward() abstract; this
    implements the canonical simplex normalization used by concrete subclasses.
    """

    def __init__(self, num_objectives: int, *, block_rows: int = 4096,
                 min_pallas_elements: int = 64 * 1024):
        self.num_objectives = num_objectives
        self.parameter_dim = num_objectives
        self.latent_dim = num_objectives
        self.bounds = [(0.0, 1.0) for _ in range(num_objectives)]
        # Round to a multiple of 8 so (tb, 128) blocks satisfy the (8, 128)
        # sublane/lane constraint. 4096 f32 rows = 2 MiB per buffer; in + out
        # double-buffered ~8 MiB -> fits v5e's 16 MiB scoped VMEM default.
        self.block_rows = max(8, ((int(block_rows) + 7) // 8) * 8)
        # Below this element count, plain XLA beats pallas_call dispatch.
        self.min_pallas_elements = int(min_pallas_elements)

    # ------------------------------------------------------------------ #

    def _pick_block_rows(self, rows: int, itemsize: int) -> int:
        # Keep per-step DMA bytes roughly constant across dtypes.
        budget = max(8, ((self.block_rows * 4) // max(itemsize, 1)) // 8 * 8)
        # Aim for >= ~4 grid steps: DMA/compute overlap + megacore sharding.
        target = -(-rows // 4)            # cdiv(rows, 4)
        target = ((target + 7) // 8) * 8  # round up to sublane multiple
        tb = max(8, min(budget, target))
        if tb >= rows:
            return rows                   # full-extent block (always legal)
        return tb

    # ------------------------------------------------------------------ #

    def __call__(self, X: jax.Array) -> jax.Array:
        B, D = X.shape
        assert D == self.latent_dim
        dtype = X.dtype
        itemsize = jnp.dtype(dtype).itemsize

        # Tiny workloads: pallas_call dispatch + a single grid step (~µs)
        # dominates; let XLA fuse the normalization directly.
        if B * D <= self.min_pallas_elements:
            return X / jnp.sum(X, axis=-1, keepdims=True)

        params = pltpu.CompilerParams(dimension_semantics=("parallel",))

        Dp = max(1, pl.next_power_of_2(D))
        if Dp <= _LANES:
            # Lane-dense path: pad D up to a power of two (zeros don't change
            # the row sum), flatten, pad the flat tail with ones up to a
            # multiple of 128, and view as (rows, 128) so every store is a
            # full-width lane-dense vst.
            Xp = X if Dp == D else jnp.pad(X, ((0, 0), (0, Dp - D)))
            total = B * Dp
            flat = Xp.reshape(total)
            rows = pl.cdiv(total, _LANES)
            pad_elems = rows * _LANES - total
            if pad_elems:
                flat = jnp.concatenate(
                    [flat, jnp.ones((pad_elems,), dtype=dtype)])
            x_view = flat.reshape(rows, _LANES)

            tb = self._pick_block_rows(rows, itemsize)
            out = pl.pallas_call(
                functools.partial(_lane_dense_kernel, group=Dp),
                out_shape=jax.ShapeDtypeStruct((rows, _LANES), dtype),
                grid=(pl.cdiv(rows, tb),),
                in_specs=[pl.BlockSpec((tb, _LANES), lambda i: (i, 0))],
                out_specs=pl.BlockSpec((tb, _LANES), lambda i: (i, 0)),
                compiler_params=params,
            )(x_view)

            out = out.reshape(rows * _LANES)
            if pad_elems:
                out = out[:total]
            out = out.reshape(B, Dp)
            if Dp != D:
                out = out[:, :D]
            return out

        # D > 128: the reduction axis already fills (and exceeds) the 128
        # lanes, so a straightforward rowwise kernel is lane-dense enough.
        tb = self._pick_block_rows(B, itemsize)
        return pl.pallas_call(
            _rowwise_kernel,
            out_shape=jax.ShapeDtypeStruct((B, D), dtype),
            grid=(pl.cdiv(B, tb),),
            in_specs=[pl.BlockSpec((tb, D), lambda i: (i, 0))],
            out_specs=pl.BlockSpec((tb, D), lambda i: (i, 0)),
            compiler_params=params,
        )(X)


# ---------------------------------------------------------------------- #


def _reference(X):
    x32 = X.astype(jnp.float32)
    return (x32 / jnp.sum(x32, axis=-1, keepdims=True)).astype(X.dtype)


if __name__ == "__main__":
    key = jax.random.PRNGKey(0)

    # (batch, num_objectives, dtype) — small, deterministic shapes covering:
    # lane-dense pow2 D, flat-tail padding, multi-block grid, non-pow2 D,
    # D > 128 rowwise path, and a narrow dtype.
    cases = [
        (256, 4, jnp.float32),    # lane-dense, exact multiple of 128 elems
        (96, 4, jnp.float32),     # lane-dense, full-extent single block
        (10, 4, jnp.float32),     # flat tail padded with ones
        (2048, 4, jnp.float32),   # multi-block grid (pipelined)
        (130, 5, jnp.float32),    # non-pow2 D -> padded to 8 lanes/group
        (7, 3, jnp.float32),      # tiny non-pow2 D
        (24, 256, jnp.float32),   # D > 128 -> rowwise kernel
        (96, 4, jnp.bfloat16),    # narrow dtype (f32 math inside kernel)
    ]

    for idx, (B, D, dt) in enumerate(cases):
        key, sub = jax.random.split(key)
        X = jax.random.uniform(sub, (B, D), dtype=jnp.float32,
                               minval=0.05, maxval=1.0).astype(dt)
        # Force the Pallas kernels even at test-sized inputs.
        transform = ScalarizationParameterTransformPallas(
            D, min_pallas_elements=0)
        Y = jax.block_until_ready(transform(X))
        Y_ref = _reference(X)
        tol = 1e-5 if dt == jnp.float32 else 3e-2
        assert Y.shape == X.shape and Y.dtype == X.dtype
        assert jnp.allclose(Y.astype(jnp.float32), Y_ref.astype(jnp.float32),
                            atol=tol, rtol=tol), f"mismatch in case {idx}"
        assert jnp.allclose(jnp.sum(Y.astype(jnp.float32), axis=-1), 1.0,
                            atol=tol), f"rows don't sum to 1 in case {idx}"

    # Default-threshold instance: tiny input takes the XLA bypass.
    key, sub = jax.random.split(key)
    Xs = jax.random.uniform(sub, (10, 4), dtype=jnp.float32,
                            minval=0.05, maxval=1.0)
    transform_default = ScalarizationParameterTransformPallas(4)
    Ys = jax.block_until_ready(transform_default(Xs))
    assert jnp.allclose(Ys, _reference(Xs), atol=1e-5, rtol=1e-5)

    print("KERNEL_OK")
</pallas_src>

<mosaic_0001>
module attributes {stable_mosaic.version = 11 : i64} {
  func.func @_lane_dense_kernel(%arg0: i32, %arg1: memref<8x128xf32, #tpu.memory_space<vmem>>, %arg2: memref<8x128xf32, #tpu.memory_space<vmem>>) attributes {dimension_semantics = [#tpu.dimension_semantics<parallel>], iteration_bounds = array<i64: 1>, scalar_prefetch = 0 : i64, scratch_operands = 0 : i64, tpu.core_type = #tpu.core_type<tc>, window_params = [{transform_indices = @transform_0, window_bounds = array<i64: 8, 128>}, {transform_indices = @transform_1, window_bounds = array<i64: 8, 128>}]} {
    %c0 = arith.constant 0 : index
    %c0_0 = arith.constant 0 : index
    %0 = vector.load %arg1[%c0, %c0_0] : memref<8x128xf32, #tpu.memory_space<vmem>>, vector<8x128xf32>
    %1 = tpu.iota {dimensions = array<i32: 1>} : vector<1x128xi32>
    %2 = vector.extract_strided_slice %0 {offsets = [0, 1], sizes = [8, 127], strides = [1, 1]} : vector<8x128xf32> to vector<8x127xf32>
    %3 = vector.extract_strided_slice %0 {offsets = [0, 0], sizes = [8, 1], strides = [1, 1]} : vector<8x128xf32> to vector<8x1xf32>
    %4 = tpu.concatenate %2, %3 in 1 : vector<8x127xf32>, vector<8x1xf32> -> vector<8x128xf32>
    %5 = vector.extract_strided_slice %0 {offsets = [0, 127], sizes = [8, 1], strides = [1, 1]} : vector<8x128xf32> to vector<8x1xf32>
    %6 = vector.extract_strided_slice %0 {offsets = [0, 0], sizes = [8, 127], strides = [1, 1]} : vector<8x128xf32> to vector<8x127xf32>
    %7 = tpu.concatenate %5, %6 in 1 : vector<8x1xf32>, vector<8x127xf32> -> vector<8x128xf32>
    %c1_i32 = arith.constant 1 : i32
    %8 = vector.broadcast %c1_i32 : i32 to vector<1x128xi32>
    %9 = arith.andi %1, %8 : vector<1x128xi32>
    %c0_i32 = arith.constant 0 : i32
    %10 = vector.broadcast %c0_i32 : i32 to vector<1x128xi32>
    %11 = arith.cmpi eq, %9, %10 : vector<1x128xi32>
    %12 = vector.shape_cast %11 : vector<1x128xi1> to vector<1x128xi1>
    %13 = vector.broadcast %12 : vector<1x128xi1> to vector<8x128xi1>
    %14 = arith.select %13, %4, %7 : vector<8x128xi1>, vector<8x128xf32>
    %15 = arith.addf %0, %14 : vector<8x128xf32>
    %16 = vector.extract_strided_slice %15 {offsets = [0, 2], sizes = [8, 126], strides = [1, 1]} : vector<8x128xf32> to vector<8x126xf32>
    %17 = vector.extract_strided_slice %15 {offsets = [0, 0], sizes = [8, 2], strides = [1, 1]} : vector<8x128xf32> to vector<8x2xf32>
    %18 = tpu.concatenate %16, %17 in 1 : vector<8x126xf32>, vector<8x2xf32> -> vector<8x128xf32>
    %19 = vector.extract_strided_slice %15 {offsets = [0, 126], sizes = [8, 2], strides = [1, 1]} : vector<8x128xf32> to vector<8x2xf32>
    %20 = vector.extract_strided_slice %15 {offsets = [0, 0], sizes = [8, 126], strides = [1, 1]} : vector<8x128xf32> to vector<8x126xf32>
    %21 = tpu.concatenate %19, %20 in 1 : vector<8x2xf32>, vector<8x126xf32> -> vector<8x128xf32>
    %c2_i32 = arith.constant 2 : i32
    %22 = vector.broadcast %c2_i32 : i32 to vector<1x128xi32>
    %23 = arith.andi %1, %22 : vector<1x128xi32>
    %c0_i32_1 = arith.constant 0 : i32
    %24 = vector.broadcast %c0_i32_1 : i32 to vector<1x128xi32>
    %25 = arith.cmpi eq, %23, %24 : vector<1x128xi32>
    %26 = vector.shape_cast %25 : vector<1x128xi1> to vector<1x128xi1>
    %27 = vector.broadcast %26 : vector<1x128xi1> to vector<8x128xi1>
    %28 = arith.select %27, %18, %21 : vector<8x128xi1>, vector<8x128xf32>
    %29 = arith.addf %15, %28 : vector<8x128xf32>
    %30 = arith.divf %0, %29 : vector<8x128xf32>
    %c0_2 = arith.constant 0 : index
    %c0_3 = arith.constant 0 : index
    %31 = vector.load %arg2[%c0_2, %c0_3] : memref<8x128xf32, #tpu.memory_space<vmem>>, vector<8x128xf32>
    tpu.vector_store %arg2[%c0_2, %c0_3], %30 {strides = array<i32>} : memref<8x128xf32, #tpu.memory_space<vmem>>, vector<8x128xf32>,
    return
  }
  func.func @transform_0(%arg0: i32) -> (i32, i32) {
    %c0_i32 = arith.constant 0 : i32
    %c0_i32_0 = arith.constant 0 : i32
    return %arg0, %c0_i32 : i32, i32
  }
  func.func @transform_1(%arg0: i32) -> (i32, i32) {
    %c0_i32 = arith.constant 0 : i32
    %c0_i32_0 = arith.constant 0 : i32
    return %arg0, %c0_i32 : i32, i32
  }
}

</mosaic_0001>

<bundles_post_ra>
// kernel: tpu_custom_call.1
= control target key start
LH: loop header
LB: loop body
LE: loop exit
PB: predicated region body
PF: predicated region fallthrough
CT: control target
= control target key end

     0   :  { %6 = vsyncpa [#allocation3], 0  ;;  %s167_s0 = inlined_call_operand.hbm [shape: f32[8,128], index: 0, kind: input, shape index: {}]   ;;  %s168_s1 = inlined_call_operand.hbm [shape: f32[8,128], index: 1, kind: output, shape index: {}]  }
   0x1   :  { %7 = vsyncpa [#allocation4], 0  ;;  %s13_s8 = sshll.u32 %s167_s0, 4  ;;  %s145_s9 = smov [#allocation2]   ;;  %s14_s8 = int_to_ptr.hbm [resolvable:$true] %s13_s8 }
   0x2   :  { %s15_s10 = sshll.u32 %s145_s9, 4  ;;  %s16_s10 = int_to_ptr.vmem [resolvable:$true] %s15_s10 }
   0x3   :  { %18 = dma.hbm_to_vmem [thread:$0]  %s14_s8, 128, %s16_s10, [#allocation3]  }
   0x4   :  { %141 = dma.done.wait [#allocation3], 128  }
   0x5   :  { %142 = vsyncadd [#allocation3], 4294967168  ;;  %v23_v0 = vld [vmem:[#allocation2] sm:$0xff]  ;;  %s146_s11 = smov 127   ;;  %s147_s12 = smov 1   ;;  %v24_v1 = vlaneseq }
   0x6   :  { %27 = vrot.lane.b32.xlu0 %v23_v0, %s146_s11  ;;  %s148_s0 = smov 126   ;;  %s149_s13 = smov 2  }
   0x7   :  { %v25_v2 = vand.u32 127, %v24_v1  ;;  %s150_s14 = smov [#allocation5]   ;;  %s75_s18 = sshll.u32 %s168_s1, 4  ;;  %s76_s18 = int_to_ptr.hbm [resolvable:$true] %s75_s18 }
   0x8   :  { %s73_s15 = sshll.u32 %s150_s14, 4  ;;  %s74_s15 = int_to_ptr.vmem [resolvable:$true] %s73_s15 }
   0x9   :  { %v33_v4 = vand.u32 1, %v25_v2  ;;  %v46_v9 = vand.u32 2, %v25_v2 }
   0xb   :  { %vm34_vm0 = vcmp.eq.s32.totalorder %v33_v4, 0  ;;  %vm47_vm1 = vcmp.eq.s32.totalorder %v46_v9, 0 }
   0xe   :  { %30 = vrot.lane.b32.xlu0 %v23_v0, %s147_s12 }
  0x78   :  { %v28_v3 = vpop.permute.xlu0 %27 }
  0x80   :  { %v31_v5 = vpop.permute.xlu0 %30 }
  0x81   :  { %v37_v6 = vsel %vm34_vm0, %v28_v3, %v31_v5 }
  0x82   :  { %v38_v7 = vadd.f32 %v37_v6, %v23_v0 }
  0x84   :  { %40 = vrot.lane.b32.xlu1 %v38_v7, %s148_s0 }
  0x8c   :  { %43 = vrot.lane.b32.xlu1 %v38_v7, %s149_s13 }
  0xf6   :  { %v41_v8 = vpop.permute.xlu1 %40 }
  0xfe   :  { %v44_v10 = vpop.permute.xlu1 %43 }
  0xff   :  { %v50_v11 = vsel %vm47_vm1, %v41_v8, %v44_v10 }
 0x100   :  { %v51_v12 = vadd.f32 %v50_v11, %v38_v7 }
 0x102   :  { %91 = vrcp.f32 %v51_v12  ;;  %v63_v16 = vand.u32 2147483648, %v51_v12  ;;  %v61_v18 = vand.u32 2147483647, %v51_v12  ;;  %vm57_vm3 = vweird.f32 %v51_v12 }
 0x104   :  { %v64_v20 = vor.u32 1.1754944e-38, %v63_v16  ;;  %vm62_vm5 = vcmp.eq.f32.partialorder %v61_v18, 8.507059e+37 }
 0x108   :  { %v92_v13 = vpop.eup %91 }
 0x109   :  { %v53_v14 = vmul.f32 %v92_v13, %v51_v12  ;;  %vm58_vm2 = vweird.f32 %v92_v13 }
 0x10a   :  { %vm59_vm4 = vmor %vm57_vm3, %vm58_vm2 }
 0x10b   :  { %v54_v15 = vsub.f32 1.0, %v53_v14 }
 0x10d   :  { %v55_v17 = vmul.f32 %v92_v13, %v54_v15 }
 0x10f   :  { %v56_v19 = vadd.f32 %v92_v13, %v55_v17 }
 0x111   :  { %v60_v21 = vsel %vm59_vm4, %v92_v13, %v56_v19 }
 0x112   :  { %v65_v22 = vsel %vm62_vm5, %v64_v20, %v60_v21 }
 0x113   :  { %v66_v23 = vmul.f32 %v65_v22, %v23_v0 }
 0x115   :  { %67 = vst [vmem:[#allocation5] sm:$0xff] %v66_v23 }
 0x116   :  { %78 = dma.vmem_to_hbm [thread:$0]  %s74_s15, 128, %s76_s18, [#allocation4]  }
 0x117   :  { %143 = dma.done.wait [#allocation4], 128  }
 0x118   :  { %144 = vsyncadd [#allocation4], 4294967168 }
 0x119   :  { %83 = vsyncpa [#allocation3], 1 }
 0x11a   :  { %84 = vsyncpa [#allocation4], 1 }

</bundles_post_ra>
